<compile_context>
chip_gen: v5e
topology: v5e:2x2
jax: 0.10.0
libtpu: 0.0.40
codegen_flags: <defaults>
</compile_context>

<pallas_src>
import jax
import jax.numpy as jnp
from jax.experimental import pallas as pl
from jax.experimental.pallas import tpu as pltpu


def _round_up(x, m):
    return ((x + m - 1) // m) * m


def swiglu_kernel(x_ref, w_ref, b_ref, o_ref):
    # Fused matmul: y[:, :tn] = x @ W1_tile + b1_tile ; y[:, tn:] = x @ W2_tile + b2_tile.
    tn = o_ref.shape[-1]
    x = x_ref[...]
    y = jnp.dot(x, w_ref[...], preferred_element_type=jnp.float32) + b_ref[...]
    h1 = y[:, :tn]
    h2 = y[:, tn:]
    o_ref[...] = (jax.nn.sigmoid(h2) * h1).astype(o_ref.dtype)


def swiglu(x, w1, b1, w2, b2, *, tile_b=None, tile_n=None):
    """SwiGlu forward: sigmoid(x @ w2 + b2) * (x @ w1 + b1).

    x: (B, F_in); w1, w2: (F_in, F_out) (transposed vs. torch nn.Linear);
    b1, b2: (F_out,).
    """
    B, F_in = x.shape
    F_out = w1.shape[1]
    out_dtype = x.dtype
    itemsize = jnp.dtype(x.dtype).itemsize

    # --- N (output-feature) tiling: multiples of 128 lanes when possible. ---
    if tile_n is None:
        if F_out % 256 == 0:
            tile_n = 256
        elif F_out % 128 == 0:
            tile_n = 128
        else:
            tile_n = F_out  # small / ragged F_out: single full-extent block
    assert F_out % tile_n == 0, "tile_n must divide F_out"
    n_n = F_out // tile_n

    # --- Batch tiling: 8-row (f32) / 16-row (bf16) aligned, capped at 256. ---
    row_align = 16 if x.dtype == jnp.bfloat16 else 8
    if tile_b is None:
        tile_b = min(256, _round_up(B, row_align))
    tile_b = _round_up(tile_b, row_align)
    b_pad = _round_up(B, tile_b)
    if b_pad != B:
        x = jnp.pad(x, ((0, b_pad - B), (0, 0)))
    n_b = b_pad // tile_b

    # --- Fuse W1/W2 and b1/b2 so each N-tile slab is [W1_tile | W2_tile]. ---
    w_fused = jnp.stack(
        [w1.reshape(F_in, n_n, tile_n), w2.reshape(F_in, n_n, tile_n)], axis=2
    ).reshape(F_in, 2 * F_out)
    b_fused = jnp.stack(
        [b1.reshape(n_n, tile_n), b2.reshape(n_n, tile_n)], axis=1
    ).reshape(1, 2 * F_out)
    w_itemsize = jnp.dtype(w_fused.dtype).itemsize

    # --- VMEM budget (double-buffered tiles + slack) and cost hint. ---
    x_tile_bytes = tile_b * F_in * itemsize
    w_tile_bytes = F_in * 2 * tile_n * w_itemsize
    bias_tile_bytes = 2 * tile_n * w_itemsize
    o_tile_bytes = tile_b * tile_n * itemsize
    vmem_needed = 2 * (x_tile_bytes + w_tile_bytes + bias_tile_bytes + o_tile_bytes) + (1 << 20)
    vmem_limit = int(min(max(vmem_needed, 32 * 1024 * 1024), 48 * 1024 * 1024))

    cost = pl.CostEstimate(
        flops=2 * b_pad * F_in * 2 * F_out,
        transcendentals=b_pad * F_out,
        bytes_accessed=(
            b_pad * F_in * itemsize
            + w_fused.size * w_itemsize
            + b_fused.size * w_itemsize
            + b_pad * F_out * itemsize
        ),
    )

    out = pl.pallas_call(
        swiglu_kernel,
        out_shape=jax.ShapeDtypeStruct((b_pad, F_out), out_dtype),
        grid_spec=pltpu.PrefetchScalarGridSpec(
            num_scalar_prefetch=0,
            grid=(n_b, n_n),
            in_specs=[
                pl.BlockSpec((tile_b, F_in), lambda i, j: (i, 0)),      # x tile
                pl.BlockSpec((F_in, 2 * tile_n), lambda i, j: (0, j)),  # fused W tile
                pl.BlockSpec((1, 2 * tile_n), lambda i, j: (0, j)),     # fused bias tile
            ],
            out_specs=pl.BlockSpec((tile_b, tile_n), lambda i, j: (i, j)),
        ),
        compiler_params=pltpu.CompilerParams(
            dimension_semantics=("parallel", "parallel"),
            vmem_limit_bytes=vmem_limit,
        ),
        cost_estimate=cost,
    )(x, w_fused, b_fused)

    return out[:B] if b_pad != B else out


if __name__ == "__main__":
    # Deterministic parameter init (synthetic; no checkpoint load).
    key = jax.random.PRNGKey(0)
    k_x, k_w1, k_b1, k_w2, k_b2 = jax.random.split(key, 5)

    batch, in_features, out_features = 8, 32, 64

    x = jax.random.normal(k_x, (batch, in_features), dtype=jnp.float32)

    # Mimic torch nn.Linear default init scale: U(-1/sqrt(in), 1/sqrt(in)).
    bound = 1.0 / (in_features ** 0.5)
    w1 = jax.random.uniform(k_w1, (in_features, out_features), jnp.float32, -bound, bound)
    b1 = jax.random.uniform(k_b1, (out_features,), jnp.float32, -bound, bound)
    w2 = jax.random.uniform(k_w2, (in_features, out_features), jnp.float32, -bound, bound)
    b2 = jax.random.uniform(k_b2, (out_features,), jnp.float32, -bound, bound)

    out = jax.block_until_ready(swiglu(x, w1, b1, w2, b2))

    # Reference check in plain JAX.
    ref = jax.nn.sigmoid(x @ w2 + b2) * (x @ w1 + b1)
    assert out.shape == (batch, out_features)
    assert jnp.allclose(out, ref, atol=1e-5, rtol=1e-5), "mismatch vs reference"

    print("KERNEL_OK")
</pallas_src>

<mosaic_0001>
module attributes {stable_mosaic.version = 11 : i64} {
  func.func @swiglu_kernel(%arg0: i32, %arg1: i32, %arg2: memref<8x32xf32, #tpu.memory_space<vmem>>, %arg3: memref<32x128xf32, #tpu.memory_space<vmem>>, %arg4: memref<1x128xf32, #tpu.memory_space<vmem>>, %arg5: memref<8x64xf32, #tpu.memory_space<vmem>>) attributes {dimension_semantics = [#tpu.dimension_semantics<parallel>, #tpu.dimension_semantics<parallel>], iteration_bounds = array<i64: 1, 1>, scalar_prefetch = 0 : i64, scratch_operands = 0 : i64, tpu.core_type = #tpu.core_type<tc>, window_params = [{transform_indices = @transform_0, window_bounds = array<i64: 8, 32>}, {transform_indices = @transform_1, window_bounds = array<i64: 32, 128>}, {transform_indices = @transform_2, window_bounds = array<i64: 1, 128>}, {transform_indices = @transform_3, window_bounds = array<i64: 8, 64>}]} {
    %c0 = arith.constant 0 : index
    %c0_0 = arith.constant 0 : index
    %0 = vector.load %arg2[%c0, %c0_0] : memref<8x32xf32, #tpu.memory_space<vmem>>, vector<8x32xf32>
    %c0_1 = arith.constant 0 : index
    %c0_2 = arith.constant 0 : index
    %1 = vector.load %arg3[%c0_1, %c0_2] : memref<32x128xf32, #tpu.memory_space<vmem>>, vector<32x128xf32>
    %cst = arith.constant dense<0.000000e+00> : vector<8x128xf32>
    %2 = tpu.matmul %0, %1, %cst {dimension_numbers = #tpu.dot_dimension_numbers<[1], [0], [0], [1], [0, 0, 1, 1], [], []>} : vector<8x32xf32>, vector<32x128xf32>, vector<8x128xf32> -> vector<8x128xf32>
    %c0_3 = arith.constant 0 : index
    %c0_4 = arith.constant 0 : index
    %3 = vector.load %arg4[%c0_3, %c0_4] : memref<1x128xf32, #tpu.memory_space<vmem>>, vector<1x128xf32>
    %4 = vector.broadcast %3 : vector<1x128xf32> to vector<8x128xf32>
    %5 = arith.addf %2, %4 : vector<8x128xf32>
    %6 = vector.extract_strided_slice %5 {offsets = [0, 0], sizes = [8, 64], strides = [1, 1]} : vector<8x128xf32> to vector<8x64xf32>
    %7 = vector.extract_strided_slice %5 {offsets = [0, 64], sizes = [8, 64], strides = [1, 1]} : vector<8x128xf32> to vector<8x64xf32>
    %8 = arith.negf %7 : vector<8x64xf32>
    %9 = math.exp %8 : vector<8x64xf32>
    %cst_5 = arith.constant 1.000000e+00 : f32
    %10 = vector.broadcast %cst_5 : f32 to vector<8x64xf32>
    %11 = arith.addf %10, %9 : vector<8x64xf32>
    %12 = arith.divf %10, %11 : vector<8x64xf32>
    %13 = arith.mulf %12, %6 : vector<8x64xf32>
    %c0_6 = arith.constant 0 : index
    %c0_7 = arith.constant 0 : index
    %14 = vector.load %arg5[%c0_6, %c0_7] : memref<8x64xf32, #tpu.memory_space<vmem>>, vector<8x64xf32>
    tpu.vector_store %arg5[%c0_6, %c0_7], %13 {strides = array<i32>} : memref<8x64xf32, #tpu.memory_space<vmem>>, vector<8x64xf32>,
    return
  }
  func.func @transform_0(%arg0: i32, %arg1: i32) -> (i32, i32) {
    %c0_i32 = arith.constant 0 : i32
    %c0_i32_0 = arith.constant 0 : i32
    return %arg0, %c0_i32 : i32, i32
  }
  func.func @transform_1(%arg0: i32, %arg1: i32) -> (i32, i32) {
    %c0_i32 = arith.constant 0 : i32
    %c0_i32_0 = arith.constant 0 : i32
    return %c0_i32, %arg1 : i32, i32
  }
  func.func @transform_2(%arg0: i32, %arg1: i32) -> (i32, i32) {
    %c0_i32 = arith.constant 0 : i32
    %c0_i32_0 = arith.constant 0 : i32
    return %c0_i32, %arg1 : i32, i32
  }
  func.func @transform_3(%arg0: i32, %arg1: i32) -> (i32, i32) {
    %c0_i32 = arith.constant 0 : i32
    return %arg0, %arg1 : i32, i32
  }
}

</mosaic_0001>

<bundles_post_ra>
// kernel: tpu_custom_call.1
= control target key start
LH: loop header
LB: loop body
LE: loop exit
PB: predicated region body
PF: predicated region fallthrough
CT: control target
= control target key end

     0   :  { %8 = vsyncpa [#allocation3], 0  ;;  %s255_s0 = inlined_call_operand.hbm [shape: f32[8,32], index: 0, kind: input, shape index: {}]   ;;  %s256_s1 = inlined_call_operand.hbm [shape: f32[32,128], index: 1, kind: input, shape index: {}]   ;;  %s257_s2 = inlined_call_operand.vmem [shape: f32[1,128], index: 2, kind: input, shape index: {}]   ;;  %s258_s3 = inlined_call_operand.hbm [shape: f32[8,64], index: 3, kind: output, shape index: {}]  }
   0x1   :  { %9 = vsyncpa [#allocation6], 0 }
   0x2   :  { %10 = vsyncpa [#allocation4], 0  ;;  %s16_s14 = sshll.u32 %s255_s0, 4  ;;  %s217_s15 = smov [#allocation2]   ;;  %s17_s14 = int_to_ptr.hbm [resolvable:$true] %s16_s14 }
   0x3   :  { %s18_s16 = sshll.u32 %s217_s15, 4  ;;  %s26_s19 = sshll.u32 %s256_s1, 4  ;;  %s19_s16 = int_to_ptr.vmem [resolvable:$true] %s18_s16  ;;  %s27_s19 = int_to_ptr.hbm [resolvable:$true] %s26_s19 }
   0x4   :  { %21 = dma.hbm_to_vmem [thread:$0]  %s17_s14, 128, %s19_s16, [#allocation3]  }
   0x5   :  { %s218_s20 = smov [#allocation5]   ;;  %s219_s22 = smov 128  }
   0x6   :  { %s28_s21 = sshll.u32 %s218_s20, 4  ;;  %s220_s23 = smov 8   ;;  %s29_s21 = int_to_ptr.vmem [resolvable:$true] %s28_s21 }
   0x7   :  { %34 = dma.hbm_to_vmem [thread:$0]  %s27_s19, 512, %s29_s21, [#allocation6], %s219_s22, %s219_s22, %s220_s23  }
   0x8   :  { %211 = dma.done.wait [#allocation3], 128  }
   0x9   :  { %212 = vsyncadd [#allocation3], 4294967168 }
   0xa   :  { %213 = dma.done.wait [#allocation6], 512  }
   0xb   :  { %214 = vsyncadd [#allocation6], 4294966784  ;;  %v49_v0 = vld [vmem:[#allocation5 + $0x18] sm:$0xff]  ;;  %v48_v1 = vld [vmem:[#allocation5 + $0x10] sm:$0xff]  ;;  %vm54_vm0 = vcmask 261120   ;;  %s221_s24 = smov 64  }
   0xc   :  { %70 = vmatpush.msra.mxu0 %v49_v0  ;;  %v47_v2 = vld [vmem:[#allocation5 + $0x8] sm:$0xff]  ;;  %v46_v3 = vld [vmem:[#allocation5] sm:$0xff]  ;;  %v45_v4 = vld [vmem:[#allocation2] sm:$0xff]  ;;  %s115_s28 = sshll.u32 %s258_s3, 4  ;;  %vm106_vm5 = vcmask 523264   ;;  %s116_s28 = int_to_ptr.hbm [resolvable:$true] %s115_s28 }
   0xd   :  { %v134_v5 = vld [vmem:[%s257_s2] ss:$0 sm:$0xff]  ;;  %s222_s2 = smov [#allocation7]  }
   0xe   :  { %71 = vmatpush.msra.mxu0 %v48_v1  ;;  %s113_s25 = sshll.u32 %s222_s2, 4  ;;  %s114_s25 = int_to_ptr.vmem [resolvable:$true] %s113_s25 }
  0x10   :  { %72 = vmatpush.msra.mxu0 %v47_v2 }
  0x12   :  { %73 = vmatpush.msra.mxu0 %v46_v3 }
  0x13   :  { %126 = vmatmul.msk.f32.vlgmr.msra.gmra.mxu0 %vm54_vm0, %v45_v4 }
  0x90   :  { %v75_v6 = vpop.f32.mrf.mxu0 }
  0x91   :  { %v76_v7 = vadd.f32 %v134_v5, %v75_v6 }
  0x93   :  { %98 = vrot.lane.b32.xlu0 %v76_v7, %s221_s24  ;;  %v127_v8 = vmul.f32 -1.442695, %v76_v7 }
  0x95   :  { %135 = vpow2.f32 %v127_v8 }
  0x9b   :  { %v136_v9 = vpop.eup %135 }
  0x9c   :  { %v81_v10 = vadd.f32 1.0, %v136_v9 }
  0x9e   :  { %137 = vrcp.f32 %v81_v10  ;;  %v93_v16 = vand.u32 2147483648, %v81_v10  ;;  %vm87_vm2 = vweird.f32 %v81_v10  ;;  %v91_v17 = vand.u32 2147483647, %v81_v10 }
  0xa0   :  { %v94_v19 = vor.u32 1.1754944e-38, %v93_v16  ;;  %vm92_vm4 = vcmp.eq.f32.partialorder %v91_v17, 8.507059e+37 }
  0xa4   :  { %v138_v11 = vpop.eup %137 }
  0xa5   :  { %v83_v12 = vmul.f32 %v138_v11, %v81_v10  ;;  %vm88_vm1 = vweird.f32 %v138_v11 }
  0xa6   :  { %vm89_vm3 = vmor %vm87_vm2, %vm88_vm1 }
  0xa7   :  { %v84_v13 = vsub.f32 1.0, %v83_v12 }
  0xa9   :  { %v85_v14 = vmul.f32 %v138_v11, %v84_v13 }
  0xab   :  { %v86_v15 = vadd.f32 %v138_v11, %v85_v14 }
  0xad   :  { %v90_v18 = vsel %vm89_vm3, %v138_v11, %v86_v15 }
  0xae   :  { %v95_v21 = vsel %vm92_vm4, %v94_v19, %v90_v18 }
 0x105   :  { %v99_v20 = vpop.permute.xlu0 %98 }
 0x106   :  { %v101_v22 = vmul.f32 %v99_v20, %v95_v21 }
 0x108   :  { %103 = vrot.lane.b32.xlu0 %v101_v22, %s221_s24 }
 0x17a   :  { %v104_v23 = vpop.permute.xlu0 %103 }
 0x17b   :  { %107 = vst.msk [vmem:[#allocation7] sm:$0xff] %vm106_vm5, %v104_v23 }
 0x17c   :  { %118 = dma.vmem_to_hbm [thread:$0]  %s114_s25, 128, %s116_s28, [#allocation4]  }
 0x17d   :  { %215 = dma.done.wait [#allocation4], 128  }
 0x17e   :  { %216 = vsyncadd [#allocation4], 4294967168 }
 0x17f   :  { %123 = vsyncpa [#allocation3], 1 }
 0x180   :  { %124 = vsyncpa [#allocation6], 1 }
 0x181   :  { %125 = vsyncpa [#allocation4], 1 }

</bundles_post_ra>
